<compile_context>
chip_gen: v7x
topology: tpu7x:2x2x1
jax: 0.10.0
libtpu: 0.0.40
codegen_flags: <defaults>
</compile_context>

<pallas_src>
import jax
import jax.numpy as jnp
from jax import lax
from jax.experimental import pallas as pl
from jax.experimental.pallas import tpu as pltpu


_TARGET_BLOCK_BYTES = 4 * 1024 * 1024      # per-block budget (fits v5e/v6e/v7x w/ dbl-buffer)
_VMEM_LIMIT_BYTES = 48 * 1024 * 1024       # explicit scoped-VMEM limit (safe on all gens)
_MAX_HW_TILE = 2048                        # keeps the unrolled lane-chunk loop short


def _largest_divisor_tile(total, unit, max_tile):
    """Largest multiple of `unit` that divides `total` and is <= max_tile.

    Falls back to `total` (full-dim block; Pallas full-dim exception) when `total`
    is not a multiple of `unit`.
    """
    if total % unit != 0:
        return total
    max_tile = max(unit, (max_tile // unit) * unit)
    best = unit
    t = unit
    while t <= min(total, max_tile):
        if total % t == 0:
            best = t
        t += unit
    return best


def conditional_norm(x, class_id, embed_weight, *, eps=1e-5):
    """ConditionalNorm forward.

    x:            [B, C, H, W] float
    class_id:     [B] int
    embed_weight: [num_classes, 2*C]  (first C cols = gamma, last C cols = beta)
    returns:      [B, C, H, W], same dtype as x
    """
    B, C, H, W = x.shape
    HW = H * W
    num_classes, two_c = embed_weight.shape
    assert two_c == 2 * C, "embedding width must be 2*in_channel"

    x3 = x.reshape(B, C, HW)                               # free reshape (NCHW contiguous)
    emb4 = embed_weight.reshape(num_classes, 2, C, 1)      # native dtype; cast in-kernel
    cid = class_id.astype(jnp.int32)

    # Compile-time Python-float constants (NOT traced arrays -> nothing captured).
    inv_n = 1.0 / float(B * HW)
    eps_f = float(eps)

    # ---------------- tile selection ----------------
    itemsize = jnp.dtype(x.dtype).itemsize
    C_TILE = _largest_divisor_tile(C, 8, 256)
    hw_budget = max(128, _TARGET_BLOCK_BYTES // (C_TILE * itemsize))
    HW_TILE = _largest_divisor_tile(HW, 128, min(hw_budget, _MAX_HW_TILE))
    n_c = C // C_TILE
    n_hw = HW // HW_TILE

    lane_chunked = (HW_TILE % 128 == 0)
    LANES = 128 if lane_chunked else 1                     # scratch-accumulator lane width

    # ---------------- pass 1: per-channel batch statistics ----------------
    def stats_kernel(x_ref, mean_ref, rstd_ref, sum_sc, sq_sc):
        b = pl.program_id(1)
        h = pl.program_id(2)

        @pl.when(jnp.logical_and(b == 0, h == 0))
        def _init():
            sum_sc[...] = jnp.zeros_like(sum_sc)
            sq_sc[...] = jnp.zeros_like(sq_sc)

        xb = x_ref[0].astype(jnp.float32)                  # (C_TILE, HW_TILE)

        if lane_chunked:
            # Lane-preserving accumulation: pure VPU adds on 128-lane chunks,
            # single cross-lane (XLU) reduce deferred to the finalize branch.
            s = jnp.zeros((C_TILE, 128), jnp.float32)
            q = jnp.zeros((C_TILE, 128), jnp.float32)
            for k in range(HW_TILE // 128):
                ck = xb[:, k * 128:(k + 1) * 128]
                s = s + ck
                q = q + ck * ck
        else:
            s = jnp.sum(xb, axis=1, keepdims=True)         # (C_TILE, 1) fallback
            q = jnp.sum(xb * xb, axis=1, keepdims=True)

        sum_sc[...] += s
        sq_sc[...] += q

        @pl.when(jnp.logical_and(b == pl.num_programs(1) - 1,
                                 h == pl.num_programs(2) - 1))
        def _finalize():
            total = jnp.sum(sum_sc[...], axis=1, keepdims=True)     # (C_TILE, 1)
            total_sq = jnp.sum(sq_sc[...], axis=1, keepdims=True)   # (C_TILE, 1)
            mean = total * inv_n
            var = jnp.maximum(total_sq * inv_n - mean * mean, 0.0)  # biased variance (BN)
            mean_ref[...] = mean
            rstd_ref[...] = lax.rsqrt(var + eps_f)

    mean, rstd = pl.pallas_call(
        stats_kernel,
        out_shape=(jax.ShapeDtypeStruct((C, 1), jnp.float32),
                   jax.ShapeDtypeStruct((C, 1), jnp.float32)),
        grid_spec=pltpu.PrefetchScalarGridSpec(
            num_scalar_prefetch=0,
            grid=(n_c, B, n_hw),                           # c parallel; (b, hw) reduction
            in_specs=[pl.BlockSpec((1, C_TILE, HW_TILE), lambda c, b, h: (b, c, h))],
            out_specs=(pl.BlockSpec((C_TILE, 1), lambda c, b, h: (c, 0)),
                       pl.BlockSpec((C_TILE, 1), lambda c, b, h: (c, 0))),
            scratch_shapes=[pltpu.VMEM((C_TILE, LANES), jnp.float32),
                            pltpu.VMEM((C_TILE, LANES), jnp.float32)],
        ),
        compiler_params=pltpu.CompilerParams(
            dimension_semantics=("parallel", "arbitrary", "arbitrary"),
            vmem_limit_bytes=_VMEM_LIMIT_BYTES),
    )(x3)

    # ---------------- pass 2: normalize + class-conditional affine ----------------
    def apply_kernel(cid_ref, x_ref, mean_ref, rstd_ref, emb_ref, o_ref):
        del cid_ref                                        # consumed by the index_map
        xb = x_ref[0].astype(jnp.float32)                  # (C_TILE, HW_TILE)
        gamma = emb_ref[0, 0].astype(jnp.float32)          # (C_TILE, 1)
        beta = emb_ref[0, 1].astype(jnp.float32)           # (C_TILE, 1)
        scale = gamma * rstd_ref[...]                      # (C_TILE, 1)
        shift = beta - scale * mean_ref[...]               # (C_TILE, 1)
        o_ref[0] = (xb * scale + shift).astype(o_ref.dtype)

    out = pl.pallas_call(
        apply_kernel,
        out_shape=jax.ShapeDtypeStruct((B, C, HW), x.dtype),
        grid_spec=pltpu.PrefetchScalarGridSpec(
            num_scalar_prefetch=1,                         # class_id -> SMEM
            grid=(B, n_c, n_hw),
            in_specs=[
                pl.BlockSpec((1, C_TILE, HW_TILE), lambda b, c, h, cid: (b, c, h)),
                pl.BlockSpec((C_TILE, 1), lambda b, c, h, cid: (c, 0)),
                pl.BlockSpec((C_TILE, 1), lambda b, c, h, cid: (c, 0)),
                # data-dependent row gather of the (gamma, beta) embedding row
                pl.BlockSpec((1, 2, C_TILE, 1), lambda b, c, h, cid: (cid[b], 0, c, 0)),
            ],
            out_specs=pl.BlockSpec((1, C_TILE, HW_TILE), lambda b, c, h, cid: (b, c, h)),
        ),
        compiler_params=pltpu.CompilerParams(
            dimension_semantics=("parallel", "parallel", "parallel"),
            vmem_limit_bytes=_VMEM_LIMIT_BYTES),
    )(cid, x3, mean, rstd, emb4)

    return out.reshape(B, C, H, W)


if __name__ == "__main__":
    key = jax.random.PRNGKey(0)
    k_x, k_e, k_c = jax.random.split(key, 3)

    # Small shapes consistent with the module: batch=2, in_channel=4, 16x16 spatial.
    B, C, H, W = 2, 4, 16, 16
    num_classes = 5

    x = jax.random.normal(k_x, (B, C, H, W), dtype=jnp.float32)
    # Module init: embed[:, :C] = 1, embed[:, C:] = 0; add a small deterministic
    # perturbation so the class-conditional gamma/beta path is numerically exercised.
    embed_weight = (jnp.concatenate(
        [jnp.ones((num_classes, C), jnp.float32),
         jnp.zeros((num_classes, C), jnp.float32)], axis=1)
        + 0.1 * jax.random.normal(k_e, (num_classes, 2 * C), dtype=jnp.float32))
    class_id = jax.random.randint(k_c, (B,), 0, num_classes, dtype=jnp.int32)

    out = conditional_norm(x, class_id, embed_weight)
    out = jax.block_until_ready(out)
    assert out.shape == (B, C, H, W)

    # Plain-JAX reference: training-mode BatchNorm2d(affine=False) + conditional affine.
    eps = 1e-5
    mean = x.mean(axis=(0, 2, 3), keepdims=True)
    var = x.var(axis=(0, 2, 3), keepdims=True)          # biased variance, like BN
    x_hat = (x - mean) / jnp.sqrt(var + eps)
    emb = embed_weight[class_id]                        # (B, 2C)
    gamma = emb[:, :C][:, :, None, None]
    beta = emb[:, C:][:, :, None, None]
    ref = gamma * x_hat + beta

    assert jnp.allclose(out, ref, atol=1e-4, rtol=1e-4), "mismatch vs reference"
    print("KERNEL_OK")
</pallas_src>

<mosaic_0001>
module attributes {stable_mosaic.version = 11 : i64} {
  func.func @stats_kernel(%arg0: i32, %arg1: i32, %arg2: i32, %arg3: memref<1x4x256xf32, #tpu.memory_space<vmem>>, %arg4: memref<4x1xf32, #tpu.memory_space<vmem>>, %arg5: memref<4x1xf32, #tpu.memory_space<vmem>>, %arg6: memref<4x128xf32, #tpu.memory_space<vmem>>, %arg7: memref<4x128xf32, #tpu.memory_space<vmem>>) attributes {dimension_semantics = [#tpu.dimension_semantics<parallel>, #tpu.dimension_semantics<arbitrary>, #tpu.dimension_semantics<arbitrary>], iteration_bounds = array<i64: 1, 2, 1>, scalar_prefetch = 0 : i64, scratch_operands = 2 : i64, tpu.core_type = #tpu.core_type<tc>, window_params = [{transform_indices = @transform_0, window_bounds = array<i64: 1, 4, 256>}, {transform_indices = @transform_1, window_bounds = array<i64: 4, 1>}, {transform_indices = @transform_2, window_bounds = array<i64: 4, 1>}]} {
    %c0_i32 = arith.constant 0 : i32
    %0 = arith.cmpi eq, %arg1, %c0_i32 : i32
    %c0_i32_0 = arith.constant 0 : i32
    %1 = arith.cmpi eq, %arg2, %c0_i32_0 : i32
    %2 = arith.andi %0, %1 : i1
    %3 = arith.extui %2 : i1 to i32
    %c0_i32_1 = arith.constant 0 : i32
    %4 = arith.cmpi ne, %3, %c0_i32_1 : i32
    scf.if %4 {
      %cst_15 = arith.constant 0.000000e+00 : f32
      %28 = vector.broadcast %cst_15 : f32 to vector<4x128xf32>
      %c0_16 = arith.constant 0 : index
      %c0_17 = arith.constant 0 : index
      %29 = vector.load %arg6[%c0_16, %c0_17] : memref<4x128xf32, #tpu.memory_space<vmem>>, vector<4x128xf32>
      tpu.vector_store %arg6[%c0_16, %c0_17], %28 {strides = array<i32>} : memref<4x128xf32, #tpu.memory_space<vmem>>, vector<4x128xf32>,
      %cst_18 = arith.constant 0.000000e+00 : f32
      %30 = vector.broadcast %cst_18 : f32 to vector<4x128xf32>
      %c0_19 = arith.constant 0 : index
      %c0_20 = arith.constant 0 : index
      %31 = vector.load %arg7[%c0_19, %c0_20] : memref<4x128xf32, #tpu.memory_space<vmem>>, vector<4x128xf32>
      tpu.vector_store %arg7[%c0_19, %c0_20], %30 {strides = array<i32>} : memref<4x128xf32, #tpu.memory_space<vmem>>, vector<4x128xf32>,
    } else {
    }
    %c0 = arith.constant 0 : index
    %c0_2 = arith.constant 0 : index
    %c0_3 = arith.constant 0 : index
    %5 = vector.load %arg3[%c0, %c0_2, %c0_3] : memref<1x4x256xf32, #tpu.memory_space<vmem>>, vector<1x4x256xf32>
    %6 = vector.shape_cast %5 : vector<1x4x256xf32> to vector<4x256xf32>
    %cst = arith.constant 0.000000e+00 : f32
    %7 = vector.broadcast %cst : f32 to vector<4x128xf32>
    %cst_4 = arith.constant 0.000000e+00 : f32
    %8 = vector.broadcast %cst_4 : f32 to vector<4x128xf32>
    %9 = vector.extract_strided_slice %6 {offsets = [0, 0], sizes = [4, 128], strides = [1, 1]} : vector<4x256xf32> to vector<4x128xf32>
    %10 = arith.addf %7, %9 : vector<4x128xf32>
    %11 = arith.mulf %9, %9 : vector<4x128xf32>
    %12 = arith.addf %8, %11 : vector<4x128xf32>
    %13 = vector.extract_strided_slice %6 {offsets = [0, 128], sizes = [4, 128], strides = [1, 1]} : vector<4x256xf32> to vector<4x128xf32>
    %14 = arith.addf %10, %13 : vector<4x128xf32>
    %15 = arith.mulf %13, %13 : vector<4x128xf32>
    %16 = arith.addf %12, %15 : vector<4x128xf32>
    %c0_5 = arith.constant 0 : index
    %c0_6 = arith.constant 0 : index
    %17 = vector.load %arg6[%c0_5, %c0_6] : memref<4x128xf32, #tpu.memory_space<vmem>>, vector<4x128xf32>
    %18 = arith.addf %17, %14 : vector<4x128xf32>
    %c0_7 = arith.constant 0 : index
    %c0_8 = arith.constant 0 : index
    %19 = vector.load %arg6[%c0_7, %c0_8] : memref<4x128xf32, #tpu.memory_space<vmem>>, vector<4x128xf32>
    tpu.vector_store %arg6[%c0_7, %c0_8], %18 {strides = array<i32>} : memref<4x128xf32, #tpu.memory_space<vmem>>, vector<4x128xf32>,
    %c0_9 = arith.constant 0 : index
    %c0_10 = arith.constant 0 : index
    %20 = vector.load %arg7[%c0_9, %c0_10] : memref<4x128xf32, #tpu.memory_space<vmem>>, vector<4x128xf32>
    %21 = arith.addf %20, %16 : vector<4x128xf32>
    %c0_11 = arith.constant 0 : index
    %c0_12 = arith.constant 0 : index
    %22 = vector.load %arg7[%c0_11, %c0_12] : memref<4x128xf32, #tpu.memory_space<vmem>>, vector<4x128xf32>
    tpu.vector_store %arg7[%c0_11, %c0_12], %21 {strides = array<i32>} : memref<4x128xf32, #tpu.memory_space<vmem>>, vector<4x128xf32>,
    %c1_i32 = arith.constant 1 : i32
    %23 = arith.cmpi eq, %arg1, %c1_i32 : i32
    %c0_i32_13 = arith.constant 0 : i32
    %24 = arith.cmpi eq, %arg2, %c0_i32_13 : i32
    %25 = arith.andi %23, %24 : i1
    %26 = arith.extui %25 : i1 to i32
    %c0_i32_14 = arith.constant 0 : i32
    %27 = arith.cmpi ne, %26, %c0_i32_14 : i32
    scf.if %27 {
      %c0_15 = arith.constant 0 : index
      %c0_16 = arith.constant 0 : index
      %28 = vector.load %arg6[%c0_15, %c0_16] : memref<4x128xf32, #tpu.memory_space<vmem>>, vector<4x128xf32>
      %cst_17 = arith.constant dense<0.000000e+00> : vector<4xf32>
      %29 = vector.multi_reduction <add>, %28, %cst_17 [1] : vector<4x128xf32> to vector<4xf32>
      %30 = vector.shape_cast %29 : vector<4xf32> to vector<4x1xf32>
      %c0_18 = arith.constant 0 : index
      %c0_19 = arith.constant 0 : index
      %31 = vector.load %arg7[%c0_18, %c0_19] : memref<4x128xf32, #tpu.memory_space<vmem>>, vector<4x128xf32>
      %cst_20 = arith.constant dense<0.000000e+00> : vector<4xf32>
      %32 = vector.multi_reduction <add>, %31, %cst_20 [1] : vector<4x128xf32> to vector<4xf32>
      %33 = vector.shape_cast %32 : vector<4xf32> to vector<4x1xf32>
      %cst_21 = arith.constant 0.001953125 : f32
      %34 = vector.broadcast %cst_21 : f32 to vector<4x1xf32>
      %35 = arith.mulf %30, %34 : vector<4x1xf32>
      %cst_22 = arith.constant 0.001953125 : f32
      %36 = vector.broadcast %cst_22 : f32 to vector<4x1xf32>
      %37 = arith.mulf %33, %36 : vector<4x1xf32>
      %38 = arith.mulf %35, %35 : vector<4x1xf32>
      %39 = arith.subf %37, %38 : vector<4x1xf32>
      %cst_23 = arith.constant 0.000000e+00 : f32
      %40 = vector.broadcast %cst_23 : f32 to vector<4x1xf32>
      %41 = arith.maximumf %39, %40 : vector<4x1xf32>
      %c0_24 = arith.constant 0 : index
      %c0_25 = arith.constant 0 : index
      %42 = vector.load %arg4[%c0_24, %c0_25] : memref<4x1xf32, #tpu.memory_space<vmem>>, vector<4x1xf32>
      tpu.vector_store %arg4[%c0_24, %c0_25], %35 {strides = array<i32>} : memref<4x1xf32, #tpu.memory_space<vmem>>, vector<4x1xf32>,
      %cst_26 = arith.constant 9.99999974E-6 : f32
      %43 = vector.broadcast %cst_26 : f32 to vector<4x1xf32>
      %44 = arith.addf %41, %43 : vector<4x1xf32>
      %45 = math.rsqrt %44 : vector<4x1xf32>
      %c0_27 = arith.constant 0 : index
      %c0_28 = arith.constant 0 : index
      %46 = vector.load %arg5[%c0_27, %c0_28] : memref<4x1xf32, #tpu.memory_space<vmem>>, vector<4x1xf32>
      tpu.vector_store %arg5[%c0_27, %c0_28], %45 {strides = array<i32>} : memref<4x1xf32, #tpu.memory_space<vmem>>, vector<4x1xf32>,
    } else {
    }
    return
  }
  func.func @transform_0(%arg0: i32, %arg1: i32, %arg2: i32) -> (i32, i32, i32) {
    %c0_i32 = arith.constant 0 : i32
    return %arg1, %arg0, %arg2 : i32, i32, i32
  }
  func.func @transform_1(%arg0: i32, %arg1: i32, %arg2: i32) -> (i32, i32) {
    %c0_i32 = arith.constant 0 : i32
    %c0_i32_0 = arith.constant 0 : i32
    return %arg0, %c0_i32 : i32, i32
  }
  func.func @transform_2(%arg0: i32, %arg1: i32, %arg2: i32) -> (i32, i32) {
    %c0_i32 = arith.constant 0 : i32
    %c0_i32_0 = arith.constant 0 : i32
    return %arg0, %c0_i32 : i32, i32
  }
}

</mosaic_0001>

<bundles_post_ra>
// kernel: tpu_custom_call.1
= control target key start
LH: loop header
LB: loop body
LE: loop exit
PB: predicated region body
PF: predicated region fallthrough
CT: control target
= control target key end

     0   :  { %8 = vsyncpa [#allocation5], 0  ;;  %s655_s0 = inlined_call_operand.hbm [shape: f32[2,4,256], index: 0, kind: input, shape index: {}]   ;;  %s656_s1 = inlined_call_operand.vmem [shape: f32[4,1], index: 1, kind: output, shape index: {0}]   ;;  %s657_s2 = inlined_call_operand.vmem [shape: f32[4,1], index: 2, kind: output, shape index: {1}]  }
   0x1   :  { %10 = vsyncpa [#allocation5 + $0x1], 0  ;;  %s527_s9 = smov 0   ;;  %s529_s10 = smov 0  }
   0x2   :  { %s531_s11 = smov 0   ;;  %s533_s12 = smov 0  }
   0x3   :  { %s535_s13 = smov 0   ;;  %s537_s14 = smov 0  }
   0x4 LB: > { %s353_s15 = sadd.s32 4294967295, %s508_s14   ;;  %s31_s16 = sadd.s32 1, %s504_s13  ;;  %s508_s14 = sphi %s537_s14, %s16_s14   ;;  %s504_s13 = sphi %s535_s13, %s667_s13   ;;  %s500_s12 = sphi %s533_s12, %s666_s12   ;;  %s496_s11 = sphi %s531_s11, %s665_s11   ;;  %s492_s10 = sphi %s529_s10, %s664_s10   ;;  %s488_s9 = sphi %s527_s9, %s663_s9  }
   0x5   : > { %p33_p0 = scmp.ge.s32.totalorder %s31_s16, 2  ;;  %s46_s17 = sadd.s32 1, %s496_s11 }
   0x6   : > { %p53_p1 = scmp.ne.s32.totalorder %s496_s11, %s492_s10  ;;  %p54_p2 = scmp.eq.s32.totalorder %s508_s14, 0 }
   0x7   : > { %s669_s16 = smov (%p33_p0, %s31_s16), 0  ;;  %p59_p4 = scmp.ne.s32.totalorder %s492_s10, %s488_s9 }
   0x8   : > { %p563_p3 = por %p54_p2, %p53_p1  ;;  %s39_s19 = ssub.s32 %s504_s13, %s669_s16 }
   0x9   : > { %p60_p5 = scmp.eq.s32.totalorder %s353_s15, 0  ;;  %p44_p6 = scmp.eq.s32.totalorder %s39_s19, 0 }
   0xa   : > { %p376_p8 = scmp.lt.s32.totalorder %s508_s14, 2  ;;  %s135_s22 = sand.u32 1, %s496_s11  }
   0xb   : > { %p570_p7 = por %p60_p5, %p59_p4  ;;  %s367_s23 = sshll.u32 %s504_s13, 7 }
   0xc   : > { %s576_s21 = scalar_select %p44_p6, %s496_s11, %s46_s17  }
   0xd   : > { %s356_s24 = sshll.u32 %s135_s22, 3  ;;  %s583_s27 = scalar_lea.hbm %s655_s0, %s367_s23 }
   0xe   : > { %s139_s28 = scalar_lea.vmem [#allocation4], %s356_s24  ;;  %p587_p9 = pnand %p376_p8, %p563_p3 }
   0xf   : > { %s151_s29 = sshll.u32 %s139_s28, 4  ;;  %s136_s3 = scalar_lea.sflag [#allocation5], %s135_s22  ;;  %s591_s29 = int_to_ptr.vmem [resolvable:$true] %s151_s29 }
  0x10   : > { %s428_s4 = scalar_lea.hbm %s583_s27, 128  ;;  %p430_p13 = pneg %p587_p9 }
  0x11   : > { %p429_p12 = scmp.ne.s32.totalorder %s583_s27, %s428_s4  ;;  %s433_s7 = scalar_lea.hbm %s655_s0, 256 }
  0x12   : > { %p434_p2 = scmp.lt.u32.totalorder %s583_s27, %s655_s0  ;;  %p435_p3 = scmp.lt.u32.totalorder %s433_s7, %s428_s4 }
  0x13   : > { %p431_p0 = pnand %p430_p13, %p429_p12  ;;  %p437_p5 = scmp.lt.u32.totalorder %s428_s4, %s583_s27 }
  0x14   : > { %p436_p4 = por %p435_p3, %p434_p2 }
  0x15   : > { %p432_p1 = pneg %p431_p0 }
  0x16   : > { %p438_p6 = por %p437_p5, %p436_p4 }
  0x18   : > { %p439_p8 = pnand %p438_p6, %p432_p1 }
  0x1a   : > { %442 = shalt.err (!%p439_p8)
}
  0x1b   : > { %s443_s15 = scalar_lea.vmem %s591_s29, 128  ;;  %s510_s17 = smov [#allocation4]  }
  0x1c   : > { %p444_p12 = scmp.ne.s32.totalorder %s591_s29, %s443_s15  ;;  %s448_s18 = sshll.u32 %s510_s17, 4  ;;  %s449_s18 = int_to_ptr.vmem [resolvable:$false] %s448_s18 }
  0x1d   : > { %s450_s19 = scalar_lea.vmem %s449_s18, 256  ;;  %p451_p11 = scmp.lt.s32.totalorder %s591_s29, %s449_s18 }
  0x1e   : > { %p446_p0 = pnand %p444_p12, %p430_p13  ;;  %p452_p2 = scmp.lt.s32.totalorder %s450_s19, %s443_s15 }
  0x20   : > { %p447_p10 = pneg %p446_p0  ;;  %p453_p3 = por %p452_p2, %p451_p11 }
  0x22   : > { %p454_p4 = pnand %p453_p3, %p447_p10 }
  0x24   : > { %457 = shalt.err (!%p454_p4)
}
  0x25   : > { %375 = dma.hbm_to_vmem [thread:$0]  (!%p587_p9), %s583_s27, 128, %s591_s29, %s136_s3  }
  0x26   : > { %p661_p1 = scmp.lt.s32.totalorder %s508_s14, 3  ;;  %p662_p5 = scmp.ge.s32.totalorder %s508_s14, 1 }
  0x28   : > { %p157_p13 = pnand %p662_p5, %p661_p1 }
  0x29   : > { %s162_s22 = sand.u32 (!%p157_p13), 1, %s492_s10  }
  0x2a   : > { %160 = sbr.rel (%p157_p13) target bundleno = 241 (0xf1), region = 24  ;;  %s360_s23 = sshll.u32 (!%p157_p13), %s162_s22, 3 }
  0x2b   : > { %s163_s24 = scalar_lea.sflag (!%p157_p13), [#allocation5], %s162_s22  ;;  %s166_s25 = scalar_lea.vmem (!%p157_p13), [#allocation4], %s360_s23 }
  0x31   : > { %483 = dma.done.wait (%p570_p7), %s163_s24, 128  }
  0x32   : > { %485 = vsyncadd (%p570_p7), %s163_s24, 4294967168  ;;  %p199_p10 = scmp.eq.s32.totalorder %s500_s12, 0 }
  0x33   : > { %v511_v0 = vmov (%p199_p10), 0.0  }
  0x34   : > { %204 = sbr.rel (!%p199_p10) target bundleno = 59 (0x3b), region = 32  ;;  %205 = vst [vmem:[#allocation2] sm:$0xf] (%p199_p10), %v511_v0  ;;  %206 = vst [vmem:[#allocation3] sm:$0xf] (%p199_p10), %v511_v0 }
  0x3b PF: > { %v207_v1 = vld [vmem:[%s166_s25] sm:$0xff]  ;;  %p223_p9 = scmp.eq.s32.totalorder %s500_s12, 1  ;;  %v217_v4 = vld [vmem:[#allocation2] sm:$0xf]  ;;  %v220_v7 = vld [vmem:[#allocation3] sm:$0xf] }
  0x3c   : > { %v212_v2 = vrot.slane %v207_v1, 4  ;;  %v209_v3 = vmul.f32 %v207_v1, %v207_v1  ;;  %vm229_vm0 = vcmask (%p223_p9), 1043456   ;;  %vm242_vm1 = vcmask (%p223_p9), 3072  }
  0x3e   : > { %v214_v5 = vadd.f32 %v212_v2, %v207_v1  ;;  %v215_v6 = vmul.f32 %v212_v2, %v212_v2  ;;  %227 = sbr.rel (!%p223_p9) target bundleno = 241 (0xf1), region = 36 }
  0x40   : > { %v218_v8 = vadd.f32 %v217_v4, %v214_v5  ;;  %v216_v9 = vadd.f32 %v215_v6, %v209_v3 }
  0x42   : > { %219 = vst [vmem:[#allocation2] sm:$0xf] %v218_v8  ;;  %v221_v10 = vadd.f32 %v220_v7, %v216_v9 }
  0x44   : > { %222 = vst [vmem:[#allocation3] sm:$0xf] %v221_v10 }
  0x49   : > { %v228_v11 = vld [vmem:[#allocation2] sm:$0xf] }
  0x4a   : > { %v230_v13 = vsel %vm229_vm0, %v228_v11, 0.0 }
  0x4b   : > { %v233_v12 = vld [vmem:[#allocation3] sm:$0xf]  ;;  %231 = vadd.xlane.f32.xlu0 %v230_v13 }
  0x4c   : > { %v234_v14 = vsel %vm229_vm0, %v233_v12, 0.0 }
  0x4f   : > { %235 = vadd.xlane.f32.xlu0 %v234_v14 }
  0xd8   : > { %v232_v15 = vpop.xlane.xlu0 %231 }
  0xd9   : > { %v237_v16 = vmul.f32 0.001953125, %v232_v15 }
  0xdb   : > { %243 = vst.msk [vmem:[%s656_s1] sm:$0xf] %vm242_vm1, %v237_v16  ;;  %v239_v18 = vmul.f32 %v237_v16, %v237_v16 }
  0xdc   : > { %v236_v17 = vpop.xlane.xlu0 %235 }
  0xdd   : > { %v238_v19 = vmul.f32 0.001953125, %v236_v17 }
  0xdf   : > { %v240_v20 = vsub.f32 %v238_v19, %v239_v18 }
  0xe1   : > { %v241_v21 = vmax.f32 %v240_v20, 0.0 }
  0xe3   : > { %v244_v22 = vadd.f32 1e-05, %v241_v21 }
  0xe5   : > { %426 = vrsqrt.f32 %v244_v22 }
  0xef   : > { %v427_v23 = vpop.eup %426 }
  0xf0   : > { %246 = vst.msk [vmem:[%s657_s2] sm:$0xf] %vm242_vm1, %v427_v23 }
  0xf1 PF: > { %s16_s14 = sadd.s32 1, %s508_s14   ;;  %s663_s9 = smov %s492_s10 }
  0xf2   : > { %p13_p7 = scmp.ge.s32.totalorder %s16_s14, 4   ;;  %s664_s10 = smov %s496_s11 }
  0xf3   : > { %s665_s11 = smov %s576_s21  ;;  %s666_s12 = smov %s504_s13 }
  0xf4   : > { %s667_s13 = smov %s669_s16  ;;  %15 = sbr.rel (!%p13_p7) target bundleno = 4 (0x4), region = 84 }
  0xfb   :  { %280 = vsyncpa [#allocation5], 1 }
  0xfc   :  { %282 = vsyncpa [#allocation5 + $0x1], 1 }

</bundles_post_ra>
